<compile_context>
chip_gen: v5e
topology: v5e:2x2
jax: 0.10.0
libtpu: 0.0.40
codegen_flags: <defaults>
</compile_context>

<pallas_src>
import functools

import numpy as np
import jax
import jax.numpy as jnp
from jax.experimental import pallas as pl
from jax.experimental.pallas import tpu as pltpu

SCALING_FACTOR = 0.18215          # vae.config.scaling_factor
COMPUTE_DTYPE = jnp.bfloat16      # kernel input / activation dtype (f32 accum)
_TM_MAX = 512                     # rows per tile (multiple of 8, v7x-safe)

_CPARAMS = pltpu.CompilerParams(
    dimension_semantics=("parallel",),        # shard row tiles across TCs (v7x)
    vmem_limit_bytes=32 * 1024 * 1024,        # explicit, fits v7x scoped VMEM
)


# ----------------------------------------------------------------------------
# Pallas kernels (all operate on one (TM, ...) row tile; f32 accumulation)
# ----------------------------------------------------------------------------
def _mm_kernel(x_ref, w_ref, b_ref, o_ref, *, act, scale):
    """o = clamp?(scale * silu?(x @ w + b))  -- scale applied BEFORE clamp."""
    y = jnp.dot(x_ref[...], w_ref[...], preferred_element_type=jnp.float32)
    y = y + b_ref[...]
    if act == "silu":
        y = y * jax.nn.sigmoid(y)
    if scale != 1.0:
        y = y * scale
    if act == "clamp":
        y = jnp.clip(y, -1.0, 1.0)
    o_ref[...] = y.astype(o_ref.dtype)


def _mm_res_kernel(x_ref, w_ref, b_ref, r_ref, o_ref):
    """o = silu(x @ w + b) + res   (UNet up-block residual fused)."""
    y = jnp.dot(x_ref[...], w_ref[...], preferred_element_type=jnp.float32)
    y = y + b_ref[...]
    y = y * jax.nn.sigmoid(y)
    o_ref[...] = (y + r_ref[...].astype(jnp.float32)).astype(o_ref.dtype)


def _mm_skip_kernel(x_ref, w_ref, b_ref, a_ref, ws_ref, o_ref, *, gamma):
    """o = silu(x @ w + b) + gamma * (skip_act @ w_skip)  (1x1 skip conv fused)."""
    y = jnp.dot(x_ref[...], w_ref[...], preferred_element_type=jnp.float32)
    y = y + b_ref[...]
    y = y * jax.nn.sigmoid(y)
    skip = jnp.dot(a_ref[...], ws_ref[...], preferred_element_type=jnp.float32)
    o_ref[...] = (y + gamma * skip).astype(o_ref.dtype)


def _mm_axpby_kernel(x_ref, w_ref, b_ref, s_ref, o_ref, *, a, b):
    """o = a * sample + b * (x @ w + bias)   (scheduler step fused into conv)."""
    y = jnp.dot(x_ref[...], w_ref[...], preferred_element_type=jnp.float32)
    y = y + b_ref[...]
    o_ref[...] = (a * s_ref[...].astype(jnp.float32) + b * y).astype(o_ref.dtype)


def _twinconv_kernel(x_ref, w1_ref, b1_ref, w2_ref, b2_ref, o_ref, *, r):
    """TwinConv.forward: (x@w1+b1)*(1-r) + (x@w2+b2)*r (detach is grad-only)."""
    x = x_ref[...]
    y1 = jnp.dot(x, w1_ref[...], preferred_element_type=jnp.float32) + b1_ref[...]
    y2 = jnp.dot(x, w2_ref[...], preferred_element_type=jnp.float32) + b2_ref[...]
    o_ref[...] = (y1 * (1.0 - r) + y2 * r).astype(o_ref.dtype)


def _axpby_kernel(x_ref, y_ref, o_ref, *, a, b):
    """o = a*x + b*y   (latent/noise blend, non-deterministic path only)."""
    o_ref[...] = (a * x_ref[...].astype(jnp.float32)
                  + b * y_ref[...].astype(jnp.float32)).astype(o_ref.dtype)


# ----------------------------------------------------------------------------
# Row-tiled pallas_call wrappers
# ----------------------------------------------------------------------------
def _row_plan(M, tm_max=_TM_MAX):
    """Return (TM, padded_M, grid)."""
    if M <= tm_max:
        return M, M, 1
    g = (M + tm_max - 1) // tm_max
    return tm_max, g * tm_max, g


def _pad_rows(x, Mp):
    M = x.shape[0]
    if Mp == M:
        return x
    return jnp.pad(x, ((0, Mp - M), (0, 0)))


def _row_spec(TM, C):
    return pl.BlockSpec((TM, C), lambda i: (i, 0))


def _const_spec(R, C):
    return pl.BlockSpec((R, C), lambda i: (0, 0))


def pallas_matmul(x, w, b, *, act="none", scale=1.0, out_dtype=COMPUTE_DTYPE):
    M, K = x.shape
    N = w.shape[1]
    TM, Mp, G = _row_plan(M)
    out = pl.pallas_call(
        functools.partial(_mm_kernel, act=act, scale=float(scale)),
        out_shape=jax.ShapeDtypeStruct((Mp, N), out_dtype),
        grid=(G,),
        in_specs=[_row_spec(TM, K), _const_spec(K, N), _const_spec(1, N)],
        out_specs=_row_spec(TM, N),
        compiler_params=_CPARAMS,
    )(_pad_rows(x, Mp), w, b)
    return out[:M] if Mp != M else out


def pallas_matmul_res(x, w, b, res, *, out_dtype=COMPUTE_DTYPE):
    M, K = x.shape
    N = w.shape[1]
    TM, Mp, G = _row_plan(M)
    out = pl.pallas_call(
        _mm_res_kernel,
        out_shape=jax.ShapeDtypeStruct((Mp, N), out_dtype),
        grid=(G,),
        in_specs=[_row_spec(TM, K), _const_spec(K, N), _const_spec(1, N),
                  _row_spec(TM, N)],
        out_specs=_row_spec(TM, N),
        compiler_params=_CPARAMS,
    )(_pad_rows(x, Mp), w, b, _pad_rows(res, Mp))
    return out[:M] if Mp != M else out


def pallas_matmul_skip(x, w, b, skip_act, w_skip, *, gamma,
                       out_dtype=COMPUTE_DTYPE):
    M, K = x.shape
    N = w.shape[1]
    Ka = skip_act.shape[1]
    TM, Mp, G = _row_plan(M)
    out = pl.pallas_call(
        functools.partial(_mm_skip_kernel, gamma=float(gamma)),
        out_shape=jax.ShapeDtypeStruct((Mp, N), out_dtype),
        grid=(G,),
        in_specs=[_row_spec(TM, K), _const_spec(K, N), _const_spec(1, N),
                  _row_spec(TM, Ka), _const_spec(Ka, N)],
        out_specs=_row_spec(TM, N),
        compiler_params=_CPARAMS,
    )(_pad_rows(x, Mp), w, b, _pad_rows(skip_act, Mp), w_skip)
    return out[:M] if Mp != M else out


def pallas_matmul_axpby(x, w, b, sample, *, a_coef, b_coef,
                        out_dtype=COMPUTE_DTYPE):
    M, K = x.shape
    N = w.shape[1]
    TM, Mp, G = _row_plan(M)
    out = pl.pallas_call(
        functools.partial(_mm_axpby_kernel, a=float(a_coef), b=float(b_coef)),
        out_shape=jax.ShapeDtypeStruct((Mp, N), out_dtype),
        grid=(G,),
        in_specs=[_row_spec(TM, K), _const_spec(K, N), _const_spec(1, N),
                  _row_spec(TM, N)],
        out_specs=_row_spec(TM, N),
        compiler_params=_CPARAMS,
    )(_pad_rows(x, Mp), w, b, _pad_rows(sample, Mp))
    return out[:M] if Mp != M else out


def pallas_twinconv(x, w1, b1, w2, b2, *, r, out_dtype=COMPUTE_DTYPE):
    M, K = x.shape
    N = w1.shape[1]
    TM, Mp, G = _row_plan(M)
    out = pl.pallas_call(
        functools.partial(_twinconv_kernel, r=float(r)),
        out_shape=jax.ShapeDtypeStruct((Mp, N), out_dtype),
        grid=(G,),
        in_specs=[_row_spec(TM, K),
                  _const_spec(K, N), _const_spec(1, N),
                  _const_spec(K, N), _const_spec(1, N)],
        out_specs=_row_spec(TM, N),
        compiler_params=_CPARAMS,
    )(_pad_rows(x, Mp), w1, b1, w2, b2)
    return out[:M] if Mp != M else out


def pallas_axpby(x, y, *, a, b, out_dtype=COMPUTE_DTYPE):
    M, N = x.shape
    TM, Mp, G = _row_plan(M)
    out = pl.pallas_call(
        functools.partial(_axpby_kernel, a=float(a), b=float(b)),
        out_shape=jax.ShapeDtypeStruct((Mp, N), out_dtype),
        grid=(G,),
        in_specs=[_row_spec(TM, N), _row_spec(TM, N)],
        out_specs=_row_spec(TM, N),
        compiler_params=_CPARAMS,
    )(_pad_rows(x, Mp), _pad_rows(y, Mp))
    return out[:M] if Mp != M else out


# ----------------------------------------------------------------------------
# JAX glue: im2col, upsample, conv wrappers
# ----------------------------------------------------------------------------
def im2col(x_nhwc, kh, kw, stride, pad):
    """(B,H,W,C) -> patches (B*Ho*Wo, kh*kw*C) in (kh, kw, Cin) minor order."""
    B, H, W, C = x_nhwc.shape
    xp = jnp.pad(x_nhwc, ((0, 0), (pad, pad), (pad, pad), (0, 0)))
    Ho = (H + 2 * pad - kh) // stride + 1
    Wo = (W + 2 * pad - kw) // stride + 1
    cols = []
    for i in range(kh):
        for j in range(kw):
            cols.append(xp[:, i:i + stride * Ho:stride, j:j + stride * Wo:stride, :])
    patches = jnp.concatenate(cols, axis=-1)          # (B, Ho, Wo, kh*kw*C)
    return patches.reshape(B * Ho * Wo, kh * kw * C), (B, Ho, Wo)
    # TODO(synk): build patches in-kernel from a halo'd VMEM tile to remove the
    #             kh*kw x HBM read amplification at real Difix image sizes.


def upsample2x(x_nhwc):
    # TODO(synk): fuse nearest-2x upsample into the consuming conv's tile load.
    return jnp.repeat(jnp.repeat(x_nhwc, 2, axis=1), 2, axis=2)


def flat2d(x_nhwc):
    B, H, W, C = x_nhwc.shape
    return x_nhwc.reshape(B * H * W, C), (B, H, W, C)


def conv2d(x_nhwc, w_mat, b, *, kh=3, kw=3, stride=1, pad=1, act="none",
           scale=1.0, out_dtype=COMPUTE_DTYPE):
    patches, (B, Ho, Wo) = im2col(x_nhwc, kh, kw, stride, pad)
    y = pallas_matmul(patches, w_mat, b, act=act, scale=scale,
                      out_dtype=out_dtype)
    return y.reshape(B, Ho, Wo, w_mat.shape[1])


def conv2d_residual(x_nhwc, w_mat, b, res_nhwc, *, kh=3, kw=3, stride=1, pad=1):
    patches, (B, Ho, Wo) = im2col(x_nhwc, kh, kw, stride, pad)
    rf, _ = flat2d(res_nhwc)
    y = pallas_matmul_res(patches, w_mat, b, rf)
    return y.reshape(B, Ho, Wo, w_mat.shape[1])


def conv2d_skip(x_nhwc, w_mat, b, skip_nhwc, w_skip, *, gamma, kh=3, kw=3,
                stride=1, pad=1):
    patches, (B, Ho, Wo) = im2col(x_nhwc, kh, kw, stride, pad)
    af, _ = flat2d(skip_nhwc)
    y = pallas_matmul_skip(patches, w_mat, b, af, w_skip, gamma=gamma)
    return y.reshape(B, Ho, Wo, w_mat.shape[1])


def conv2d_axpby(x_nhwc, w_mat, b, sample_nhwc, *, a_coef, b_coef, kh=3, kw=3,
                 stride=1, pad=1):
    patches, (B, Ho, Wo) = im2col(x_nhwc, kh, kw, stride, pad)
    sf, _ = flat2d(sample_nhwc)
    y = pallas_matmul_axpby(patches, w_mat, b, sf, a_coef=a_coef, b_coef=b_coef)
    return y.reshape(B, Ho, Wo, w_mat.shape[1])


def _make_conv(key, cout, cin, kh, kw, std=0.05):
    """PyTorch (Cout,Cin,kh,kw) init -> matmul form (kh*kw*Cin, Cout), f32."""
    w = std * jax.random.normal(key, (cout, cin, kh, kw), dtype=jnp.float32)
    wm = jnp.transpose(w, (2, 3, 1, 0)).reshape(kh * kw * cin, cout)
    return wm, jnp.zeros((1, cout), jnp.float32)


# ----------------------------------------------------------------------------
# Difix (miniature, deterministic-weight) forward pass
# ----------------------------------------------------------------------------
class DifixPallas:
    def __init__(self, seed=1):
        ks = jax.random.split(jax.random.PRNGKey(seed), 16)
        C_IN, C1, C2, LAT, U1, U2, D0, D1 = 3, 8, 16, 4, 16, 32, 16, 8
        self.LAT = LAT
        CD = COMPUTE_DTYPE
        p = {}

        def add(name, key, cout, cin, kh, kw, w_scale=None):
            wm, b = _make_conv(key, cout, cin, kh, kw)
            if w_scale is not None:
                wm = wm * w_scale
            p[name] = (wm.astype(CD), b)

        # --- VAE encoder (stores current_down_blocks for decoder skips) ---
        add("enc1", ks[0], C1, C_IN, 3, 3)
        add("enc2", ks[1], C2, C1, 3, 3)
        add("quant", ks[2], 2 * LAT, C2, 1, 1)
        # --- UNet: conv_in is a TwinConv (pretrained / current) ---
        add("cin_pre", ks[3], U1, LAT, 3, 3)
        add("cin_cur", ks[4], U1, LAT, 3, 3)
        add("udown", ks[5], U2, U1, 3, 3)
        add("umid", ks[6], U2, U2, 3, 3)
        add("uup", ks[7], U1, U2, 3, 3)
        add("uout", ks[8], LAT, U1, 3, 3)
        # --- VAE decoder; 1/scaling_factor folded into the 1x1 dec_in weight ---
        add("dec_in", ks[9], D0, LAT, 1, 1, w_scale=1.0 / SCALING_FACTOR)
        add("dec_up1", ks[10], D1, D0, 3, 3)
        add("dec_up2", ks[11], D1, D1, 3, 3)
        add("dec_out", ks[12], C_IN, D1, 3, 3)
        self.p = p
        # torch.nn.init.constant_(skip_conv_k.weight, 1e-5); matmul form (Cin, Cout)
        self.skip1_w = jnp.full((C2, D0), 1e-5, CD)   # skip for deepest encoder act
        self.skip2_w = jnp.full((C1, D1), 1e-5, CD)
        # TODO(synk): real decoder has 4 skip convs (512/512/512/256 ch); this
        # reduced-depth decoder exercises 2 with identical semantics.

        # one-step scheduler coefficients at timestep 99 (linear beta schedule)
        betas = np.linspace(1e-4, 0.02, 1000, dtype=np.float64)
        acp = float(np.cumprod(1.0 - betas)[99])
        self.sched_a = 1.0 / np.sqrt(acp)                   # coeff on sample
        self.sched_b = -np.sqrt(1.0 - acp) / np.sqrt(acp)   # coeff on model_pred
        # TODO(synk): make_1step_sched internals unknown; single-step x0
        # prediction (DDIM to t=0) is used for sched.step here.

    # ---------------- VAE encoder ----------------
    def vae_encode(self, x_nhwc):
        w, b = self.p["enc1"]
        a1 = conv2d(x_nhwc, w, b, stride=2, act="silu")
        w, b = self.p["enc2"]
        a2 = conv2d(a1, w, b, stride=2, act="silu")
        w, b = self.p["quant"]
        moments = conv2d(a2, w, b, kh=1, kw=1, pad=0, act="none",
                         scale=SCALING_FACTOR)
        # TODO(synk): latent_dist.sample() draws noise; deterministic mode uses the mean.
        latent = moments[..., : self.LAT]
        return latent, (a1, a2)   # current_down_blocks

    # ---------------- UNet + fused scheduler step ----------------
    def unet_and_sched(self, z_nhwc, r, use_twin):
        p = self.p
        if use_twin:
            patches, (B, Ho, Wo) = im2col(z_nhwc, 3, 3, 1, 1)
            wp, bp = p["cin_pre"]
            wc, bc = p["cin_cur"]
            h0 = pallas_twinconv(patches, wp, bp, wc, bc, r=r)
            h0 = h0.reshape(B, Ho, Wo, wc.shape[1])
        else:
            # r == 1.0: TwinConv reduces exactly to conv_in_curr; statically
            # skip the dead pretrained dot + its weight DMA.
            wc, bc = p["cin_cur"]
            h0 = conv2d(z_nhwc, wc, bc, act="none")
        # TODO(synk): timestep embedding / attention blocks of UNet2DModel omitted.
        w, b = p["udown"]
        d = conv2d(h0, w, b, stride=2, act="silu")
        w, b = p["umid"]
        m = conv2d(d, w, b, act="silu")
        w, b = p["uup"]
        u = conv2d_residual(upsample2x(m), w, b, h0)      # silu(conv) + h0 fused
        # uout conv fused with scheduler step:
        #   x_denoised = sched_a * sample + sched_b * model_pred
        w, b = p["uout"]
        return conv2d_axpby(u, w, b, z_nhwc,
                            a_coef=self.sched_a, b_coef=self.sched_b)

    # ---------------- VAE decoder ----------------
    def vae_decode(self, z_nhwc, skip_acts, gamma):
        p = self.p
        a1, a2 = skip_acts
        # dec_in (1x1, 1/scaling folded) fused with skip_conv_1 on a2
        w, b = self.p["dec_in"]
        h = conv2d_skip(z_nhwc, w, b, a2, self.skip1_w, gamma=gamma,
                        kh=1, kw=1, pad=0)
        # dec_up1 fused with skip_conv_2 on a1
        w, b = p["dec_up1"]
        h = conv2d_skip(upsample2x(h), w, b, a1, self.skip2_w, gamma=gamma)
        w, b = p["dec_up2"]
        h = conv2d(upsample2x(h), w, b, act="silu")
        # final conv with fused clamp(-1, 1); output stays f32
        w, b = p["dec_out"]
        return conv2d(h, w, b, act="clamp", out_dtype=jnp.float32)

    # ---------------- Difix.forward ----------------
    def forward(self, c_t_nchw, deterministic=True, r=1.0, noise_map=None):
        x = jnp.transpose(c_t_nchw, (0, 2, 3, 1)).astype(COMPUTE_DTYPE)  # NCHW->NHWC
        encoded, skip_acts = self.vae_encode(x)
        if deterministic:
            sample = encoded
            gamma = 1.0
            x_denoised = self.unet_and_sched(sample, r=1.0, use_twin=False)
        else:
            # TODO(synk): LoRA adapter re-weighting (set_adapters) omitted.
            nm = jnp.transpose(noise_map, (0, 2, 3, 1)).astype(COMPUTE_DTYPE)
            ef, es = flat2d(encoded)
            nf, _ = flat2d(nm)
            sample = pallas_axpby(ef, nf, a=r, b=1.0 - r).reshape(es)
            gamma = r
            x_denoised = self.unet_and_sched(sample, r=r, use_twin=True)
        out_nhwc = self.vae_decode(x_denoised, skip_acts, gamma)
        return jnp.transpose(out_nhwc, (0, 3, 1, 2)).astype(jnp.float32)  # NCHW


if __name__ == "__main__":
    key = jax.random.PRNGKey(0)
    k1, k2 = jax.random.split(key)
    c_t = jax.random.normal(k1, (2, 3, 16, 16), dtype=jnp.float32)   # NCHW input
    model = DifixPallas()

    # deterministic path (r = 1.0)
    out = model.forward(c_t, deterministic=True)
    out = jax.block_until_ready(out)
    assert out.shape == (2, 3, 16, 16)
    assert bool(jnp.all(out <= 1.0)) and bool(jnp.all(out >= -1.0))
    assert bool(jnp.all(jnp.isfinite(out)))

    # non-deterministic path (exercises TwinConv blend + latent/noise axpby)
    noise_map = jax.random.normal(k2, (2, 4, 4, 4), dtype=jnp.float32)  # latent NCHW
    out2 = model.forward(c_t, deterministic=False, r=0.5, noise_map=noise_map)
    out2 = jax.block_until_ready(out2)
    assert out2.shape == (2, 3, 16, 16)
    assert bool(jnp.all(out2 <= 1.0)) and bool(jnp.all(out2 >= -1.0))
    assert bool(jnp.all(jnp.isfinite(out2)))

    print("KERNEL_OK")
</pallas_src>

<mosaic_0001>
module attributes {stable_mosaic.version = 11 : i64} {
  func.func @_mm_kernel(%arg0: i32, %arg1: memref<128x27xbf16, #tpu.memory_space<vmem>>, %arg2: memref<27x8xbf16, #tpu.memory_space<vmem>>, %arg3: memref<1x8xf32, #tpu.memory_space<vmem>>, %arg4: memref<128x8xbf16, #tpu.memory_space<vmem>>) attributes {dimension_semantics = [#tpu.dimension_semantics<parallel>], iteration_bounds = array<i64: 1>, scalar_prefetch = 0 : i64, scratch_operands = 0 : i64, tpu.core_type = #tpu.core_type<tc>, window_params = [{transform_indices = @transform_0, window_bounds = array<i64: 128, 27>}, {pipeline_mode = #tpu.pipeline_mode<synchronous>, transform_indices = @transform_1, window_bounds = array<i64: 27, 8>}, {pipeline_mode = #tpu.pipeline_mode<synchronous>, transform_indices = @transform_2, window_bounds = array<i64: 1, 8>}, {transform_indices = @transform_3, window_bounds = array<i64: 128, 8>}]} {
    %c0 = arith.constant 0 : index
    %c0_0 = arith.constant 0 : index
    %0 = vector.load %arg1[%c0, %c0_0] : memref<128x27xbf16, #tpu.memory_space<vmem>>, vector<128x27xbf16>
    %c0_1 = arith.constant 0 : index
    %c0_2 = arith.constant 0 : index
    %1 = vector.load %arg2[%c0_1, %c0_2] : memref<27x8xbf16, #tpu.memory_space<vmem>>, vector<27x8xbf16>
    %cst = arith.constant dense<0.000000e+00> : vector<128x8xf32>
    %2 = tpu.matmul %0, %1, %cst {dimension_numbers = #tpu.dot_dimension_numbers<[1], [0], [0], [1], [0, 0, 1, 1], [], []>} : vector<128x27xbf16>, vector<27x8xbf16>, vector<128x8xf32> -> vector<128x8xf32>
    %c0_3 = arith.constant 0 : index
    %c0_4 = arith.constant 0 : index
    %3 = vector.load %arg3[%c0_3, %c0_4] : memref<1x8xf32, #tpu.memory_space<vmem>>, vector<1x8xf32>
    %4 = vector.broadcast %3 : vector<1x8xf32> to vector<128x8xf32>
    %5 = arith.addf %2, %4 : vector<128x8xf32>
    %6 = arith.negf %5 : vector<128x8xf32>
    %7 = math.exp %6 : vector<128x8xf32>
    %cst_5 = arith.constant 1.000000e+00 : f32
    %8 = vector.broadcast %cst_5 : f32 to vector<128x8xf32>
    %9 = arith.addf %8, %7 : vector<128x8xf32>
    %10 = arith.divf %8, %9 : vector<128x8xf32>
    %11 = arith.mulf %5, %10 : vector<128x8xf32>
    %12 = arith.truncf %11 : vector<128x8xf32> to vector<128x8xbf16>
    %c0_6 = arith.constant 0 : index
    %c0_7 = arith.constant 0 : index
    %13 = vector.load %arg4[%c0_6, %c0_7] : memref<128x8xbf16, #tpu.memory_space<vmem>>, vector<128x8xbf16>
    tpu.vector_store %arg4[%c0_6, %c0_7], %12 {strides = array<i32>} : memref<128x8xbf16, #tpu.memory_space<vmem>>, vector<128x8xbf16>,
    return
  }
  func.func @transform_0(%arg0: i32) -> (i32, i32) {
    %c0_i32 = arith.constant 0 : i32
    %c0_i32_0 = arith.constant 0 : i32
    return %arg0, %c0_i32 : i32, i32
  }
  func.func @transform_1(%arg0: i32) -> (i32, i32) {
    %c0_i32 = arith.constant 0 : i32
    %c0_i32_0 = arith.constant 0 : i32
    %c0_i32_1 = arith.constant 0 : i32
    return %c0_i32, %c0_i32_0 : i32, i32
  }
  func.func @transform_2(%arg0: i32) -> (i32, i32) {
    %c0_i32 = arith.constant 0 : i32
    %c0_i32_0 = arith.constant 0 : i32
    %c0_i32_1 = arith.constant 0 : i32
    return %c0_i32, %c0_i32_0 : i32, i32
  }
  func.func @transform_3(%arg0: i32) -> (i32, i32) {
    %c0_i32 = arith.constant 0 : i32
    %c0_i32_0 = arith.constant 0 : i32
    return %arg0, %c0_i32 : i32, i32
  }
}

</mosaic_0001>

<bundles_post_ra>
// kernel: tpu_custom_call.1
= control target key start
LH: loop header
LB: loop body
LE: loop exit
PB: predicated region body
PF: predicated region fallthrough
CT: control target
= control target key end

     0   :  { %vm115_vm0 = vcmask 1044480   ;;  %vm116_vm1 = vcmask 1045504   ;;  %v674_v2 = vmov 65535   ;;  %vm90_vm2 = vcmask 220160   ;;  %s1099_s1 = inlined_call_operand.vmem [shape: bf16[27,8], index: 1, kind: input, shape index: {}]   ;;  %s1100_s2 = inlined_call_operand.vmem [shape: f32[1,8], index: 2, kind: input, shape index: {}]   ;;  %s1101_s0 = inlined_call_operand.vmem [shape: bf16[128,27], index: 0, kind: input, shape index: {}]   ;;  %s1102_s3 = inlined_call_operand.vmem [shape: bf16[128,8], index: 3, kind: output, shape index: {}]  }
   0x1   :  { %v566_v0 = vld [vmem:[%s1099_s1 + $0x8] sm:$0xf]  ;;  %v601_v1 = vld [vmem:[%s1099_s1 + $0x8] sm:$0x30]  ;;  %v117_v3 = vsel %vm115_vm0, 4294967295, %v674_v2  ;;  %v600_v7 = vld [vmem:[%s1099_s1] sm:$0xff] }
   0x2   :  { %v567_v4 = vor.u32 %v601_v1, %v566_v0  ;;  %v118_v5 = vsel %vm116_vm1, %v117_v3, 0  ;;  %v592_v8 = vld [vmem:[%s1101_s0] sm:$0xff]  ;;  %v594_v9 = vld [vmem:[%s1101_s0 + $0x10] sm:$0xff]  ;;  %v593_v12 = vld [vmem:[%s1101_s0 + $0x8] sm:$0xff]  ;;  %vm507_vm8 = vcmask 60416  }
   0x3   :  { %v596_v10 = vld [vmem:[%s1101_s0 + $0x20] sm:$0xff]  ;;  %v598_v11 = vld [vmem:[%s1101_s0 + $0x30] sm:$0xff]  ;;  %v595_v13 = vld [vmem:[%s1101_s0 + $0x18] sm:$0xff] }
   0x4   :  { %v120_v6 = vand.u32 %v567_v4, %v118_v5  ;;  %v597_v14 = vld [vmem:[%s1101_s0 + $0x28] sm:$0xff]  ;;  %v599_v15 = vld [vmem:[%s1101_s0 + $0x38] sm:$0xff]  ;;  %v739_v16 = vld [vmem:[%s1100_s2] ss:$0 sm:$0xff] }
   0x6   :  { %128 = vmatpush.bf16.msra.mxu0 %v120_v6  ;;  %602 = vmatpush.bf16.msra.mxu1 %v120_v6 }
   0x7   :  { %603 = vmatpush.bf16.msra.mxu2 %v120_v6  ;;  %604 = vmatpush.bf16.msra.mxu3 %v120_v6 }
   0xa   :  { %129 = vmatpush.bf16.msra.mxu0 %v600_v7  ;;  %605 = vmatpush.bf16.msra.mxu1 %v600_v7 }
   0xb   :  { %606 = vmatpush.bf16.msra.mxu2 %v600_v7  ;;  %607 = vmatpush.bf16.msra.mxu3 %v600_v7 }
   0xd   :  { %568 = vmatmul.msk.bf16.vlgmr.msra.gmra.mxu0 %vm90_vm2, %v592_v8  ;;  %570 = vmatmul.msk.bf16.vlgmr.msra.gmra.mxu1 %vm90_vm2, %v594_v9 }
   0xe   :  { %572 = vmatmul.msk.bf16.vlgmr.msra.gmra.mxu2 %vm90_vm2, %v596_v10  ;;  %574 = vmatmul.msk.bf16.vlgmr.msra.gmra.mxu3 %vm90_vm2, %v598_v11 }
  0x1d   :  { %569 = vmatmul.msk.bf16.gmra.mxu0 %vm90_vm2, %v593_v12  ;;  %571 = vmatmul.msk.bf16.gmra.mxu1 %vm90_vm2, %v595_v13 }
  0x1e   :  { %573 = vmatmul.msk.bf16.gmra.mxu2 %vm90_vm2, %v597_v14  ;;  %575 = vmatmul.msk.bf16.gmra.mxu3 %vm90_vm2, %v599_v15 }
  0x8a   :  { %v131_v17 = vpop.f32.mrf.mxu0  ;;  %v141_v18 = vpop.f32.mrf.mxu1 }
  0x8b   :  { %v742_v19 = vadd.f32 %v739_v16, %v131_v17  ;;  %v745_v20 = vadd.f32 %v739_v16, %v141_v18 }
  0x8d   :  { %v576_v21 = vmul.f32 -1.442695, %v742_v19  ;;  %v580_v22 = vmul.f32 -1.442695, %v745_v20 }
  0x8f   :  { %610 = vpow2.f32 %v576_v21 }
  0x90   :  { %612 = vpow2.f32 %v580_v22 }
  0x91   :  { %v151_v23 = vpop.f32.mrf.mxu2  ;;  %v161_v24 = vpop.f32.mrf.mxu3 }
  0x92   :  { %v750_v25 = vadd.f32 %v739_v16, %v151_v23  ;;  %v753_v26 = vadd.f32 %v739_v16, %v161_v24  ;;  %v133_v27 = vpop.f32.mrf.mxu0  ;;  %v143_v28 = vpop.f32.mrf.mxu1 }
  0x93   :  { %v756_v29 = vadd.f32 %v739_v16, %v133_v27  ;;  %v759_v30 = vadd.f32 %v739_v16, %v143_v28 }
  0x94   :  { %v584_v31 = vmul.f32 -1.442695, %v750_v25  ;;  %v588_v32 = vmul.f32 -1.442695, %v753_v26 }
  0x95   :  { %v611_v33 = vpop.eup %610  ;;  %v577_v36 = vmul.f32 -1.442695, %v756_v29  ;;  %v581_v38 = vmul.f32 -1.442695, %v759_v30 }
  0x96   :  { %v613_v34 = vpop.eup %612  ;;  %v763_v35 = vadd.f32 1.0, %v611_v33  ;;  %614 = vpow2.f32 %v584_v31 }
  0x97   :  { %v766_v37 = vadd.f32 1.0, %v613_v34  ;;  %616 = vpow2.f32 %v588_v32 }
  0x98   :  { %618 = vrcp.f32 %v763_v35  ;;  %v244_v43 = vand.u32 2147483647, %v763_v35  ;;  %v246_v44 = vand.u32 2147483648, %v763_v35  ;;  %vm240_vm3 = vweird.f32 %v763_v35 }
  0x99   :  { %620 = vrcp.f32 %v766_v37  ;;  %v153_v39 = vpop.f32.mrf.mxu2  ;;  %v163_v40 = vpop.f32.mrf.mxu3  ;;  %v304_v46 = vand.u32 2147483647, %v766_v37  ;;  %v306_v47 = vand.u32 2147483648, %v766_v37  ;;  %vm300_vm4 = vweird.f32 %v766_v37 }
  0x9a   :  { %622 = vpow2.f32 %v577_v36  ;;  %v772_v41 = vadd.f32 %v739_v16, %v153_v39  ;;  %v136_v42 = vpop.f32.mrf.mxu0  ;;  %v780_v49 = vadd.f32 %v739_v16, %v163_v40  ;;  %v146_v55 = vpop.f32.mrf.mxu1  ;;  %vm792_vm5 = vcmp.eq.f32.partialorder %v244_v43, 8.507059e+37 }
  0x9b   :  { %624 = vpow2.f32 %v581_v38  ;;  %v785_v52 = vadd.f32 %v739_v16, %v136_v42  ;;  %v247_v59 = vor.u32 1.1754944e-38, %v246_v44  ;;  %vm798_vm6 = vcmp.eq.f32.partialorder %v304_v46, 8.507059e+37 }
  0x9c   :  { %v615_v45 = vpop.eup %614  ;;  %v585_v48 = vmul.f32 -1.442695, %v772_v41  ;;  %v307_v63 = vor.u32 1.1754944e-38, %v306_v47  ;;  %v589_v0 = vmul.f32 -1.442695, %v780_v49  ;;  %v808_v4 = vadd.f32 %v739_v16, %v146_v55 }
  0x9d   :  { %v617_v50 = vpop.eup %616  ;;  %v782_v51 = vadd.f32 1.0, %v615_v45  ;;  %v805_v3 = vmul.f32 -1.442695, %v785_v52 }
  0x9e   :  { %v619_v53 = vpop.eup %618  ;;  %v789_v54 = vadd.f32 1.0, %v617_v50  ;;  %v821_v17 = vmul.f32 -1.442695, %v808_v4 }
  0x9f   :  { %v621_v56 = vpop.eup %620  ;;  %v236_v57 = vmul.f32 %v619_v53, %v763_v35  ;;  %626 = vrcp.f32 %v782_v51  ;;  %vm241_vm7 = vweird.f32 %v619_v53  ;;  %v364_v6 = vand.u32 2147483647, %v782_v51 }
  0xa0   :  { %v623_v60 = vpop.eup %622  ;;  %v296_v61 = vmul.f32 %v621_v56, %v766_v37  ;;  %628 = vpow2.f32 %v585_v48  ;;  %v366_v7 = vand.u32 2147483648, %v782_v51  ;;  %v426_v9 = vand.u32 2147483648, %v789_v54  ;;  %vm242_vm11 = vmor %vm240_vm3, %vm241_vm7 }
  0xa1   :  { %v625_v1 = vpop.eup %624  ;;  %v237_v2 = vsub.f32 1.0, %v236_v57  ;;  %630 = vrcp.f32 %v789_v54  ;;  %v813_v10 = vadd.f32 1.0, %v623_v60  ;;  %vm301_vm9 = vweird.f32 %v621_v56  ;;  %v156_v24 = vpop.f32.mrf.mxu2 }
  0xa2   :  { %v297_v5 = vsub.f32 1.0, %v296_v61  ;;  %v815_v11 = vadd.f32 1.0, %v625_v1  ;;  %v424_v13 = vand.u32 2147483647, %v789_v54  ;;  %632 = vpow2.f32 %v589_v0  ;;  %vm302_vm14 = vmor %vm300_vm4, %vm301_vm9 }
  0xa3   :  { %v238_v8 = vmul.f32 %v619_v53, %v237_v2  ;;  %vm360_vm10 = vweird.f32 %v782_v51  ;;  %634 = vrcp.f32 %v813_v10  ;;  %vm827_vm12 = vcmp.eq.f32.partialorder %v364_v6, 8.507059e+37 }
  0xa4   :  { %v298_v12 = vmul.f32 %v621_v56, %v297_v5  ;;  %vm420_vm13 = vweird.f32 %v789_v54  ;;  %v367_v31 = vor.u32 1.1754944e-38, %v366_v7  ;;  %v427_v32 = vor.u32 1.1754944e-38, %v426_v9 }
  0xa5   :  { %v627_v14 = vpop.eup %626  ;;  %v239_v15 = vadd.f32 %v619_v53, %v238_v8  ;;  %636 = vrcp.f32 %v815_v11  ;;  %vm839_vm15 = vcmp.eq.f32.partialorder %v424_v13, 8.507059e+37  ;;  %v259_v40 = vand.u32 2147483647, %v813_v10 }
  0xa6   :  { %v629_v18 = vpop.eup %628  ;;  %v299_v21 = vadd.f32 %v621_v56, %v298_v12  ;;  %v356_v22 = vmul.f32 %v627_v14, %v782_v51  ;;  %v848_v42 = vadd.f32 %v739_v16, %v156_v24  ;;  %vm361_vm0 = vweird.f32 %v627_v14 }
  0xa7   :  { %v631_v27 = vpop.eup %630  ;;  %v243_v28 = vsel %vm242_vm11, %v619_v53, %v239_v15  ;;  %vm255_vm1 = vweird.f32 %v813_v10  ;;  %v853_v50 = vadd.f32 1.0, %v629_v18  ;;  %vm362_vm3 = vmor %vm360_vm10, %vm361_vm0  ;;  %vm862_vm4 = vcmp.eq.f32.partialorder %v259_v40, 8.507059e+37 }
  0xa8   :  { %v248_v33 = vsel %vm792_vm5, %v247_v59, %v243_v28  ;;  %v303_v34 = vsel %vm302_vm14, %v621_v56, %v299_v21  ;;  %v357_v35 = vsub.f32 1.0, %v356_v22  ;;  %v416_v36 = vmul.f32 %v631_v27, %v789_v54  ;;  %v633_v43 = vpop.eup %632 }
  0xa9   :  { %v475_v39 = vmul.f32 %v248_v33, %v742_v19  ;;  %v308_v37 = vsel %vm798_vm6, %v307_v63, %v303_v34  ;;  %v635_v47 = vpop.eup %634  ;;  %vm421_vm2 = vweird.f32 %v631_v27  ;;  %v261_v19 = vand.u32 2147483648, %v813_v10 }
  0xaa   :  { %v479_v44 = vmul.f32 %v308_v37, %v745_v20  ;;  %v358_v45 = vmul.f32 %v627_v14, %v357_v35  ;;  %v417_v46 = vsub.f32 1.0, %v416_v36  ;;  %v251_v57 = vmul.f32 %v635_v47, %v813_v10  ;;  %vm422_vm6 = vmor %vm420_vm13, %vm421_vm2  ;;  %v166_v10 = vpop.f32.mrf.mxu3  ;;  %v148_v37 = vpop.f32.mrf.mxu1 }
  0xab   :  { %v491_v48 = vpack.c.bf16 %v475_v39, %v475_v39  ;;  %v637_v58 = vpop.eup %636  ;;  %vm315_vm5 = vweird.f32 %v815_v11  ;;  %638 = vrcp.f32 %v853_v50  ;;  %v868_v59 = vadd.f32 1.0, %v633_v43 }
  0xac   :  { %v495_v53 = vpack.c.bf16 %v479_v44, %v479_v44  ;;  %v359_v55 = vadd.f32 %v627_v14, %v358_v45  ;;  %v418_v56 = vmul.f32 %v631_v27, %v417_v46  ;;  %v252_v62 = vsub.f32 1.0, %v251_v57 }
  0xad   :  { %508 = vst.msk [vmem:[%s1102_s3] sm:$0xf] %vm507_vm8, %v491_v48  ;;  %v311_v51 = vmul.f32 %v637_v58, %v815_v11  ;;  %vm256_vm7 = vweird.f32 %v635_v47  ;;  %v319_v0 = vand.u32 2147483647, %v815_v11  ;;  %v321_v1 = vand.u32 2147483648, %v815_v11  ;;  %v138_v11 = vpop.f32.mrf.mxu0 }
  0xae   :  { %512 = vst.msk [vmem:[%s1102_s3 + $0x10] sm:$0xf] %vm507_vm8, %v495_v53  ;;  %v363_v60 = vsel %vm362_vm3, %v627_v14, %v359_v55  ;;  %v419_v61 = vadd.f32 %v631_v27, %v418_v56  ;;  %v253_v6 = vmul.f32 %v635_v47, %v252_v62  ;;  %vm316_vm9 = vweird.f32 %v637_v58  ;;  %vm257_vm10 = vmor %vm255_vm1, %vm256_vm7 }
  0xaf   :  { %v368_v63 = vsel %vm827_vm12, %v367_v31, %v363_v60  ;;  %v312_v7 = vsub.f32 1.0, %v311_v51  ;;  %v379_v9 = vand.u32 2147483647, %v853_v50  ;;  %640 = vrcp.f32 %v868_v59  ;;  %vm317_vm13 = vmor %vm315_vm5, %vm316_vm9 }
  0xb0   :  { %v483_v2 = vmul.f32 %v368_v63, %v750_v25  ;;  %v423_v5 = vsel %vm422_vm6, %v631_v27, %v419_v61  ;;  %v254_v13 = vadd.f32 %v635_v47, %v253_v6  ;;  %v262_v25 = vor.u32 1.1754944e-38, %v261_v19 }
  0xb1   :  { %v428_v8 = vsel %vm839_vm15, %v427_v32, %v423_v5  ;;  %v313_v14 = vmul.f32 %v637_v58, %v312_v7  ;;  %v639_v15 = vpop.eup %638  ;;  %vm891_vm11 = vcmp.eq.f32.partialorder %v319_v0, 8.507059e+37  ;;  %v322_v21 = vor.u32 1.1754944e-38, %v321_v1 }
  0xb2   :  { %v499_v54 = vpack.c.bf16 %v483_v2, %v483_v2  ;;  %v487_v12 = vmul.f32 %v428_v8, %v753_v26  ;;  %vm375_vm12 = vweird.f32 %v853_v50  ;;  %v258_v22 = vsel %vm257_vm10, %v635_v47, %v254_v13  ;;  %v168_v1 = vpop.f32.mrf.mxu3 }
  0xb3   :  { %v314_v23 = vadd.f32 %v637_v58, %v313_v14  ;;  %v371_v24 = vmul.f32 %v639_v15, %v853_v50  ;;  %v263_v27 = vsel %vm862_vm4, %v262_v25, %v258_v22  ;;  %vm376_vm14 = vweird.f32 %v639_v15 }
  0xb4   :  { %516 = vst.msk [vmem:[%s1102_s3 + $0x20] sm:$0xf] %vm507_vm8, %v499_v54  ;;  %v503_v26 = vpack.c.bf16 %v487_v12, %v487_v12  ;;  %vm906_vm15 = vcmp.eq.f32.partialorder %v379_v9, 8.507059e+37  ;;  %v381_v31 = vand.u32 2147483648, %v853_v50  ;;  %v476_v32 = vmul.f32 %v263_v27, %v756_v29  ;;  %vm377_vm0 = vmor %vm375_vm12, %vm376_vm14  ;;  %v158_v50 = vpop.f32.mrf.mxu2 }
  0xb5   :  { %v318_v33 = vsel %vm317_vm13, %v637_v58, %v314_v23  ;;  %v372_v34 = vsub.f32 1.0, %v371_v24  ;;  %642 = vpow2.f32 %v805_v3  ;;  %v641_v35 = vpop.eup %640  ;;  %v586_v38 = vmul.f32 -1.442695, %v848_v42 }
  0xb6   :  { %520 = vst.msk [vmem:[%s1102_s3 + $0x30] sm:$0xf] %vm507_vm8, %v503_v26  ;;  %v323_v36 = vsel %vm891_vm11, %v322_v21, %v318_v33  ;;  %644 = vpow2.f32 %v821_v17  ;;  %v922_v39 = vadd.f32 %v739_v16, %v166_v10  ;;  %v492_v40 = vpack.c.bf16 %v476_v32, %v476_v32 }
  0xb7   :  { %v480_v29 = vmul.f32 %v323_v36, %v759_v30  ;;  %v373_v43 = vmul.f32 %v639_v15, %v372_v34  ;;  %v431_v44 = vmul.f32 %v641_v35, %v868_v59  ;;  %v382_v3 = vor.u32 1.1754944e-38, %v381_v31 }
  0xb8   :  { %646 = vpow2.f32 %v586_v38  ;;  %v590_v45 = vmul.f32 -1.442695, %v922_v39  ;;  %v928_v46 = vadd.f32 %v739_v16, %v138_v11  ;;  %509 = vst.msk [vmem:[%s1102_s3 + $0x4] sm:$0xf] %vm507_vm8, %v492_v40  ;;  %v935_v30 = vadd.f32 %v739_v16, %v148_v37 }
  0xb9   :  { %v496_v17 = vpack.c.bf16 %v480_v29, %v480_v29  ;;  %v374_v47 = vadd.f32 %v639_v15, %v373_v43  ;;  %v432_v48 = vsub.f32 1.0, %v431_v44  ;;  %v439_v19 = vand.u32 2147483647, %v868_v59 }
  0xba   :  { %v441_v53 = vand.u32 2147483648, %v868_v59  ;;  %648 = vpow2.f32 %v590_v45  ;;  %v579_v55 = vmul.f32 -1.442695, %v928_v46  ;;  %vm436_vm1 = vweird.f32 %v641_v35 }
  0xbb   :  { %v643_v56 = vpop.eup %642  ;;  %513 = vst.msk [vmem:[%s1102_s3 + $0x14] sm:$0xf] %vm507_vm8, %v496_v17  ;;  %v378_v57 = vsel %vm377_vm0, %v639_v15, %v374_v47  ;;  %v433_v58 = vmul.f32 %v641_v35, %v432_v48  ;;  %v583_v20 = vmul.f32 -1.442695, %v935_v30  ;;  %vm435_vm2 = vweird.f32 %v868_v59 }
  0xbc   :  { %v645_v60 = vpop.eup %644  ;;  %v383_v61 = vsel %vm906_vm15, %v382_v3, %v378_v57  ;;  %v951_v62 = vadd.f32 1.0, %v643_v56  ;;  %650 = vpow2.f32 %v579_v55  ;;  %vm437_vm3 = vmor %vm435_vm2, %vm436_vm1  ;;  %v442_v5 = vor.u32 1.1754944e-38, %v441_v53 }
  0xbd   :  { %v484_v51 = vmul.f32 %v383_v61, %v772_v41  ;;  %v434_v63 = vadd.f32 %v641_v35, %v433_v58  ;;  %v954_v0 = vadd.f32 1.0, %v645_v60  ;;  %652 = vpow2.f32 %v583_v20 }
  0xbe   :  { %v647_v2 = vpop.eup %646  ;;  %654 = vrcp.f32 %v951_v62  ;;  %v958_v6 = vadd.f32 %v739_v16, %v158_v50  ;;  %vm440_vm4 = vcmp.eq.f32.partialorder %v439_v19, 8.507059e+37  ;;  %v274_v9 = vand.u32 2147483647, %v951_v62 }
  0xbf   :  { %v500_v7 = vpack.c.bf16 %v484_v51, %v484_v51  ;;  %v438_v59 = vsel %vm437_vm3, %v641_v35, %v434_v63  ;;  %656 = vrcp.f32 %v954_v0  ;;  %v963_v54 = vadd.f32 %v739_v16, %v168_v1 }
  0xc0   :  { %v649_v8 = vpop.eup %648  ;;  %v443_v41 = vsel %vm440_vm4, %v442_v5, %v438_v59  ;;  %v276_v13 = vand.u32 2147483648, %v951_v62  ;;  %v971_v14 = vadd.f32 1.0, %v647_v2  ;;  %v334_v18 = vand.u32 2147483647, %v954_v0 }
  0xc1   :  { %517 = vst.msk [vmem:[%s1102_s3 + $0x24] sm:$0xf] %vm507_vm8, %v500_v7  ;;  %v488_v12 = vmul.f32 %v443_v41, %v780_v49  ;;  %v973_v15 = vadd.f32 1.0, %v649_v8  ;;  %v336_v21 = vand.u32 2147483648, %v954_v0  ;;  %v587_v16 = vmul.f32 -1.442695, %v958_v6 }
  0xc2   :  { %v651_v25 = vpop.eup %650  ;;  %658 = vrcp.f32 %v971_v14  ;;  %vm270_vm5 = vweird.f32 %v951_v62  ;;  %v591_v49 = vmul.f32 -1.442695, %v963_v54  ;;  %vm987_vm6 = vcmp.eq.f32.partialorder %v274_v9, 8.507059e+37 }
  0xc3   :  { %v653_v26 = vpop.eup %652  ;;  %v504_v22 = vpack.c.bf16 %v488_v12, %v488_v12  ;;  %660 = vrcp.f32 %v973_v15  ;;  %v277_v28 = vor.u32 1.1754944e-38, %v276_v13  ;;  %vm330_vm7 = vweird.f32 %v954_v0 }
  0xc4   :  { %v655_v23 = vpop.eup %654  ;;  %vm993_vm9 = vcmp.eq.f32.partialorder %v334_v18, 8.507059e+37  ;;  %v337_v33 = vor.u32 1.1754944e-38, %v336_v21  ;;  %662 = vpow2.f32 %v587_v16  ;;  %v394_v11 = vand.u32 2147483647, %v971_v14 }
  0xc5   :  { %v657_v24 = vpop.eup %656  ;;  %521 = vst.msk [vmem:[%s1102_s3 + $0x34] sm:$0xf] %vm507_vm8, %v504_v22  ;;  %v266_v10 = vmul.f32 %v655_v23, %v951_v62  ;;  %v396_v35 = vand.u32 2147483648, %v971_v14  ;;  %v999_v36 = vadd.f32 1.0, %v651_v25  ;;  %vm271_vm10 = vweird.f32 %v655_v23 }
  0xc6   :  { %v326_v31 = vmul.f32 %v657_v24, %v954_v0  ;;  %v1001_v37 = vadd.f32 1.0, %v653_v26  ;;  %664 = vpow2.f32 %v591_v49  ;;  %v454_v43 = vand.u32 2147483647, %v973_v15  ;;  %vm272_vm15 = vmor %vm270_vm5, %vm271_vm10 }
  0xc7   :  { %v267_v34 = vsub.f32 1.0, %v266_v10  ;;  %v456_v44 = vand.u32 2147483648, %v973_v15  ;;  %666 = vrcp.f32 %v999_v36  ;;  %vm331_vm11 = vweird.f32 %v657_v24 }
  0xc8   :  { %v327_v38 = vsub.f32 1.0, %v326_v31  ;;  %v659_v40 = vpop.eup %658  ;;  %vm390_vm12 = vweird.f32 %v971_v14  ;;  %vm1008_vm13 = vcmp.eq.f32.partialorder %v394_v11, 8.507059e+37  ;;  %vm450_vm14 = vweird.f32 %v973_v15  ;;  %vm332_vm0 = vmor %vm330_vm7, %vm331_vm11 }
  0xc9   :  { %v268_v29 = vmul.f32 %v655_v23, %v267_v34  ;;  %v661_v3 = vpop.eup %660  ;;  %v386_v17 = vmul.f32 %v659_v40, %v971_v14  ;;  %v397_v57 = vor.u32 1.1754944e-38, %v396_v35  ;;  %668 = vrcp.f32 %v1001_v37 }
  0xca   :  { %v328_v45 = vmul.f32 %v657_v24, %v327_v38  ;;  %v446_v19 = vmul.f32 %v661_v3, %v973_v15  ;;  %v663_v53 = vpop.eup %662  ;;  %vm1020_vm1 = vcmp.eq.f32.partialorder %v454_v43, 8.507059e+37  ;;  %v457_v60 = vor.u32 1.1754944e-38, %v456_v44 }
  0xcb   :  { %v269_v47 = vadd.f32 %v655_v23, %v268_v29  ;;  %v387_v56 = vsub.f32 1.0, %v386_v17  ;;  %vm391_vm2 = vweird.f32 %v659_v40  ;;  %vm451_vm3 = vweird.f32 %v661_v3 }
  0xcc   :  { %v329_v55 = vadd.f32 %v657_v24, %v328_v45  ;;  %v447_v20 = vsub.f32 1.0, %v446_v19  ;;  %v665_v61 = vpop.eup %664  ;;  %v289_v41 = vand.u32 2147483647, %v999_v36  ;;  %vm392_vm4 = vmor %vm390_vm12, %vm391_vm2  ;;  %v291_v13 = vand.u32 2147483648, %v999_v36 }
  0xcd   :  { %v273_v58 = vsel %vm272_vm15, %v655_v23, %v269_v47  ;;  %v388_v63 = vmul.f32 %v659_v40, %v387_v56  ;;  %v667_v1 = vpop.eup %666  ;;  %vm452_vm5 = vmor %vm450_vm14, %vm451_vm3  ;;  %v1039_v16 = vadd.f32 1.0, %v665_v61  ;;  %vm285_vm7 = vweird.f32 %v999_v36 }
  0xce   :  { %v278_v62 = vsel %vm987_vm6, %v277_v28, %v273_v58  ;;  %v333_v51 = vsel %vm332_vm0, %v657_v24, %v329_v55  ;;  %v448_v5 = vmul.f32 %v661_v3, %v447_v20  ;;  %v281_v8 = vmul.f32 %v667_v1, %v999_v36 }
  0xcf   :  { %v477_v2 = vmul.f32 %v278_v62, %v785_v52  ;;  %v338_v0 = vsel %vm993_vm9, %v337_v33, %v333_v51  ;;  %v389_v59 = vadd.f32 %v659_v40, %v388_v63  ;;  %v1035_v52 = vadd.f32 1.0, %v663_v53  ;;  %v669_v25 = vpop.eup %668 }
  0xd0   :  { %v481_v7 = vmul.f32 %v338_v0, %v808_v4  ;;  %v449_v12 = vadd.f32 %v661_v3, %v448_v5  ;;  %v282_v4 = vsub.f32 1.0, %v281_v8  ;;  %vm286_vm6 = vweird.f32 %v667_v1 }
  0xd1   :  { %v493_v9 = vpack.c.bf16 %v477_v2, %v477_v2  ;;  %v393_v21 = vsel %vm392_vm4, %v659_v40, %v389_v59  ;;  %v341_v22 = vmul.f32 %v669_v25, %v1001_v37  ;;  %670 = vrcp.f32 %v1035_v52  ;;  %vm287_vm9 = vmor %vm285_vm7, %vm286_vm6 }
  0xd2   :  { %v497_v18 = vpack.c.bf16 %v481_v7, %v481_v7  ;;  %v398_v14 = vsel %vm1008_vm13, %v397_v57, %v393_v21  ;;  %v453_v26 = vsel %vm452_vm5, %v661_v3, %v449_v12  ;;  %v283_v49 = vmul.f32 %v667_v1, %v282_v4 }
  0xd3   :  { %510 = vst.msk [vmem:[%s1102_s3 + $0x8] sm:$0xf] %vm507_vm8, %v493_v9  ;;  %v485_v15 = vmul.f32 %v398_v14, %v848_v42  ;;  %v458_v23 = vsel %vm1020_vm1, %v457_v60, %v453_v26  ;;  %v292_v10 = vor.u32 1.1754944e-38, %v291_v13  ;;  %v342_v27 = vsub.f32 1.0, %v341_v22 }
  0xd4   :  { %514 = vst.msk [vmem:[%s1102_s3 + $0x18] sm:$0xf] %vm507_vm8, %v497_v18  ;;  %v489_v24 = vmul.f32 %v458_v23, %v922_v39  ;;  %v284_v31 = vadd.f32 %v667_v1, %v283_v49  ;;  %v351_v32 = vand.u32 2147483648, %v1001_v37  ;;  %672 = vrcp.f32 %v1039_v16 }
  0xd5   :  { %v501_v28 = vpack.c.bf16 %v485_v15, %v485_v15  ;;  %v343_v42 = vmul.f32 %v669_v25, %v342_v27  ;;  %vm346_vm10 = vweird.f32 %v669_v25  ;;  %v349_v34 = vand.u32 2147483647, %v1001_v37 }
  0xd6   :  { %v505_v33 = vpack.c.bf16 %v489_v24, %v489_v24  ;;  %v288_v39 = vsel %vm287_vm9, %v667_v1, %v284_v31  ;;  %vm290_vm11 = vcmp.eq.f32.partialorder %v289_v41, 8.507059e+37  ;;  %vm345_vm12 = vweird.f32 %v1001_v37 }
  0xd7   :  { %518 = vst.msk [vmem:[%s1102_s3 + $0x28] sm:$0xf] %vm507_vm8, %v501_v28  ;;  %v293_v11 = vsel %vm290_vm11, %v292_v10, %v288_v39  ;;  %v344_v35 = vadd.f32 %v669_v25, %v343_v42  ;;  %v671_v36 = vpop.eup %670  ;;  %vm347_vm13 = vmor %vm345_vm12, %vm346_vm10  ;;  %v352_v40 = vor.u32 1.1754944e-38, %v351_v32  ;;  %vm350_vm14 = vcmp.eq.f32.partialorder %v349_v34, 8.507059e+37 }
  0xd8   :  { %522 = vst.msk [vmem:[%s1102_s3 + $0x38] sm:$0xf] %vm507_vm8, %v505_v33  ;;  %v478_v38 = vmul.f32 %v293_v11, %v928_v46  ;;  %v401_v43 = vmul.f32 %v671_v36, %v1035_v52  ;;  %v409_v46 = vand.u32 2147483647, %v1035_v52  ;;  %v411_v37 = vand.u32 2147483648, %v1035_v52 }
  0xd9   :  { %v348_v29 = vsel %vm347_vm13, %v669_v25, %v344_v35  ;;  %vm406_vm15 = vweird.f32 %v671_v36  ;;  %vm405_vm0 = vweird.f32 %v1035_v52  ;;  %v469_v58 = vand.u32 2147483647, %v1039_v16 }
  0xda   :  { %v673_v44 = vpop.eup %672  ;;  %v494_v3 = vpack.c.bf16 %v478_v38, %v478_v38  ;;  %v353_v45 = vsel %vm350_vm14, %v352_v40, %v348_v29  ;;  %v402_v47 = vsub.f32 1.0, %v401_v43  ;;  %vm407_vm2 = vmor %vm405_vm0, %vm406_vm15  ;;  %v412_v20 = vor.u32 1.1754944e-38, %v411_v37 }
  0xdb   :  { %v482_v17 = vmul.f32 %v353_v45, %v935_v30  ;;  %v461_v48 = vmul.f32 %v673_v44, %v1039_v16  ;;  %v471_v30 = vand.u32 2147483648, %v1039_v16  ;;  %vm466_vm1 = vweird.f32 %v673_v44 }
  0xdc   :  { %511 = vst.msk [vmem:[%s1102_s3 + $0xc] sm:$0xf] %vm507_vm8, %v494_v3  ;;  %v403_v53 = vmul.f32 %v671_v36, %v402_v47  ;;  %vm410_vm3 = vcmp.eq.f32.partialorder %v409_v46, 8.507059e+37  ;;  %vm465_vm4 = vweird.f32 %v1039_v16  ;;  %vm470_vm6 = vcmp.eq.f32.partialorder %v469_v58, 8.507059e+37 }
  0xdd   :  { %v498_v19 = vpack.c.bf16 %v482_v17, %v482_v17  ;;  %v462_v55 = vsub.f32 1.0, %v461_v48  ;;  %vm467_vm5 = vmor %vm465_vm4, %vm466_vm1  ;;  %v472_v62 = vor.u32 1.1754944e-38, %v471_v30 }
  0xde   :  { %v404_v56 = vadd.f32 %v671_v36, %v403_v53 }
  0xdf   :  { %515 = vst.msk [vmem:[%s1102_s3 + $0x1c] sm:$0xf] %vm507_vm8, %v498_v19  ;;  %v463_v57 = vmul.f32 %v673_v44, %v462_v55 }
  0xe0   :  { %v408_v50 = vsel %vm407_vm2, %v671_v36, %v404_v56 }
  0xe1   :  { %v464_v60 = vadd.f32 %v673_v44, %v463_v57  ;;  %v413_v61 = vsel %vm410_vm3, %v412_v20, %v408_v50 }
  0xe2   :  { %v486_v51 = vmul.f32 %v413_v61, %v958_v6 }
  0xe3   :  { %v468_v63 = vsel %vm467_vm5, %v673_v44, %v464_v60 }
  0xe4   :  { %v473_v1 = vsel %vm470_vm6, %v472_v62, %v468_v63  ;;  %v502_v2 = vpack.c.bf16 %v486_v51, %v486_v51 }
  0xe5   :  { %v490_v0 = vmul.f32 %v473_v1, %v963_v54 }
  0xe6   :  { %519 = vst.msk [vmem:[%s1102_s3 + $0x2c] sm:$0xf] %vm507_vm8, %v502_v2 }
  0xe7   :  { %v506_v5 = vpack.c.bf16 %v490_v0, %v490_v0 }
  0xe9   :  { %523 = vst.msk [vmem:[%s1102_s3 + $0x3c] sm:$0xf] %vm507_vm8, %v506_v5 }

</bundles_post_ra>
